<compile_context>
chip_gen: v5e
topology: v5e:2x2
jax: 0.10.0
libtpu: 0.0.40
codegen_flags: <defaults>
</compile_context>

<pallas_src>
import functools

import jax
import jax.numpy as jnp
from jax.experimental import pallas as pl
from jax.experimental.pallas import tpu as pltpu

IN_F, H1_F, H2_F, OUT_F = 4, 15, 20, 3     # real feature sizes
P_H1, P_H2 = 16, 24                        # hidden dims padded to sublane multiples


def _round_up(n, m):
    return ((n + m - 1) // m) * m


def _ann_kernel(xT_ref, w1_ref, b1_ref, w2_ref, b2_ref, w3_ref, b3_ref, oT_ref):
    """One batch tile (batch on lanes): O^T = W3 @ relu(W2 @ relu(W1 @ X^T + b1) + b2) + b3."""
    xT = xT_ref[...].astype(jnp.float32)                                   # (4, TB)
    h1 = jnp.dot(w1_ref[...], xT, preferred_element_type=jnp.float32) + b1_ref[...]
    h1 = jnp.maximum(h1, 0.0)                                              # (16, TB)
    h2 = jnp.dot(w2_ref[...], h1, preferred_element_type=jnp.float32) + b2_ref[...]
    h2 = jnp.maximum(h2, 0.0)                                              # (24, TB)
    out = jnp.dot(w3_ref[...], h2, preferred_element_type=jnp.float32) + b3_ref[...]
    oT_ref[...] = out.astype(oT_ref.dtype)                                 # (3, TB)


@functools.partial(jax.jit, static_argnames=("block_b",))
def ann_forward_t(xT, w1, b1, w2, b2, w3, b3, *, block_b=65536):
    """Feature-major forward: xT (4, B) -> (3, B). Weights in PyTorch (out, in) layout."""
    f_in, B = xT.shape
    assert f_in == IN_F
    out_dtype = xT.dtype

    # ---- batch tile selection -------------------------------------------
    block_b = max(128, (int(block_b) // 128) * 128)            # lane-aligned tile cap
    b128 = _round_up(max(B, 1), 128)
    if b128 < 256:
        tb = b128                                              # single tiny step
    else:
        # >=2 grid steps whenever possible so v7x's 2 TensorCores both get work.
        tb = min(block_b, _round_up(pl.cdiv(b128, 2), 128))
    grid_n = pl.cdiv(b128, tb)
    tb = _round_up(pl.cdiv(b128, grid_n), 128)                 # rebalance -> minimal padding
    b_pad = grid_n * tb

    if b_pad != B:
        xT = jnp.pad(xT, ((0, 0), (0, b_pad - B)))

    # ---- params: zero-pad hidden dims (VMEM-resident, tiny, fetched once) --
    f32 = jnp.float32
    w1p = jnp.pad(w1.astype(f32), ((0, P_H1 - H1_F), (0, 0)))               # (16, 4)
    b1p = jnp.pad(b1.astype(f32), (0, P_H1 - H1_F))[:, None]                # (16, 1)
    w2p = jnp.pad(w2.astype(f32), ((0, P_H2 - H2_F), (0, P_H1 - H1_F)))     # (24, 16)
    b2p = jnp.pad(b2.astype(f32), (0, P_H2 - H2_F))[:, None]                # (24, 1)
    w3p = jnp.pad(w3.astype(f32), ((0, 0), (0, P_H2 - H2_F)))               # (3, 24)
    b3p = b3.astype(f32)[:, None]                                           # (3, 1)

    itemsize = jnp.dtype(out_dtype).itemsize
    flops = 2 * b_pad * (IN_F * H1_F + H1_F * H2_F + H2_F * OUT_F)
    param_bytes = 4 * (w1p.size + b1p.size + w2p.size + b2p.size + w3p.size + b3p.size)
    bytes_accessed = b_pad * itemsize * (IN_F + OUT_F) + param_bytes

    outT = pl.pallas_call(
        _ann_kernel,
        out_shape=jax.ShapeDtypeStruct((OUT_F, b_pad), out_dtype),
        grid_spec=pltpu.PrefetchScalarGridSpec(
            num_scalar_prefetch=0,
            grid=(grid_n,),
            in_specs=[
                # activations: blocked over batch (lane axis), no feature padding
                pl.BlockSpec((IN_F, tb), lambda i: (0, i)),
                # params: constant block index -> DMA'd once, VMEM-resident
                pl.BlockSpec((P_H1, IN_F), lambda i: (0, 0)),
                pl.BlockSpec((P_H1, 1), lambda i: (0, 0)),
                pl.BlockSpec((P_H2, P_H1), lambda i: (0, 0)),
                pl.BlockSpec((P_H2, 1), lambda i: (0, 0)),
                pl.BlockSpec((OUT_F, P_H2), lambda i: (0, 0)),
                pl.BlockSpec((OUT_F, 1), lambda i: (0, 0)),
            ],
            out_specs=pl.BlockSpec((OUT_F, tb), lambda i: (0, i)),
        ),
        compiler_params=pltpu.CompilerParams(
            dimension_semantics=("parallel",),
            vmem_limit_bytes=48 * 1024 * 1024,
        ),
        cost_estimate=pl.CostEstimate(
            flops=flops, transcendentals=0, bytes_accessed=bytes_accessed
        ),
    )(xT, w1p, b1p, w2p, b2p, w3p, b3p)

    if b_pad != B:
        outT = outT[:, :B]
    return outT


@functools.partial(jax.jit, static_argnames=("block_b",))
def ann_forward(x, w1, b1, w2, b2, w3, b3, *, block_b=65536):
    """PyTorch-equivalent interface: x (B, 4) -> (B, 3).

    The transposes here are extra XLA passes; for peak end-to-end throughput
    keep activations feature-major in the calling model and use ann_forward_t.
    """
    return ann_forward_t(x.T, w1, b1, w2, b2, w3, b3, block_b=block_b).T


def init_params(key):
    """Deterministic init matching nn.Linear defaults, PyTorch (out, in) layout."""
    dims = [(IN_F, H1_F), (H1_F, H2_F), (H2_F, OUT_F)]
    params = []
    for i, (fan_in, fan_out) in enumerate(dims):
        kw, kb = jax.random.split(jax.random.fold_in(key, i))
        bound = 1.0 / jnp.sqrt(float(fan_in))
        w = jax.random.uniform(kw, (fan_out, fan_in), jnp.float32, -bound, bound)
        b = jax.random.uniform(kb, (fan_out,), jnp.float32, -bound, bound)
        params.extend([w, b])
    return params


def _reference(x, w1, b1, w2, b2, w3, b3):
    h = jnp.maximum(x @ w1.T + b1, 0.0)
    h = jnp.maximum(h @ w2.T + b2, 0.0)
    return h @ w3.T + b3


if __name__ == "__main__":
    key = jax.random.PRNGKey(0)
    k_x1, k_x2, k_p = jax.random.split(key, 3)
    w1, b1, w2, b2, w3, b3 = init_params(k_p)

    # Case 1: PyTorch-style (B, 4) interface; B a multiple of 128 (no pad/slice path).
    B1 = 512
    x1 = jax.random.normal(k_x1, (B1, IN_F), dtype=jnp.float32)
    out1 = jax.block_until_ready(ann_forward(x1, w1, b1, w2, b2, w3, b3))
    ref1 = _reference(x1, w1, b1, w2, b2, w3, b3)
    assert out1.shape == (B1, OUT_F)
    assert jnp.allclose(out1, ref1, atol=1e-4, rtol=1e-4)

    # Case 2: feature-major fast path; ragged batch + multi-step grid (block_b=256).
    B2 = 300
    x2T = jax.random.normal(k_x2, (IN_F, B2), dtype=jnp.float32)
    out2T = jax.block_until_ready(
        ann_forward_t(x2T, w1, b1, w2, b2, w3, b3, block_b=256)
    )
    ref2 = _reference(x2T.T, w1, b1, w2, b2, w3, b3)
    assert out2T.shape == (OUT_F, B2)
    assert jnp.allclose(out2T.T, ref2, atol=1e-4, rtol=1e-4)

    print("KERNEL_OK")
</pallas_src>

<mosaic_0001>
module attributes {stable_mosaic.version = 11 : i64} {
  func.func @_ann_kernel(%arg0: i32, %arg1: memref<4x256xf32, #tpu.memory_space<vmem>>, %arg2: memref<16x4xf32, #tpu.memory_space<vmem>>, %arg3: memref<16x1xf32, #tpu.memory_space<vmem>>, %arg4: memref<24x16xf32, #tpu.memory_space<vmem>>, %arg5: memref<24x1xf32, #tpu.memory_space<vmem>>, %arg6: memref<3x24xf32, #tpu.memory_space<vmem>>, %arg7: memref<3x1xf32, #tpu.memory_space<vmem>>, %arg8: memref<3x256xf32, #tpu.memory_space<vmem>>) attributes {dimension_semantics = [#tpu.dimension_semantics<parallel>], iteration_bounds = array<i64: 2>, scalar_prefetch = 0 : i64, scratch_operands = 0 : i64, tpu.core_type = #tpu.core_type<tc>, window_params = [{transform_indices = @transform_0, window_bounds = array<i64: 4, 256>}, {pipeline_mode = #tpu.pipeline_mode<synchronous>, transform_indices = @transform_1, window_bounds = array<i64: 16, 4>}, {pipeline_mode = #tpu.pipeline_mode<synchronous>, transform_indices = @transform_2, window_bounds = array<i64: 16, 1>}, {pipeline_mode = #tpu.pipeline_mode<synchronous>, transform_indices = @transform_3, window_bounds = array<i64: 24, 16>}, {pipeline_mode = #tpu.pipeline_mode<synchronous>, transform_indices = @transform_4, window_bounds = array<i64: 24, 1>}, {pipeline_mode = #tpu.pipeline_mode<synchronous>, transform_indices = @transform_5, window_bounds = array<i64: 3, 24>}, {pipeline_mode = #tpu.pipeline_mode<synchronous>, transform_indices = @transform_6, window_bounds = array<i64: 3, 1>}, {transform_indices = @transform_7, window_bounds = array<i64: 3, 256>}]} {
    %c0 = arith.constant 0 : index
    %c0_0 = arith.constant 0 : index
    %0 = vector.load %arg1[%c0, %c0_0] : memref<4x256xf32, #tpu.memory_space<vmem>>, vector<4x256xf32>
    %c0_1 = arith.constant 0 : index
    %c0_2 = arith.constant 0 : index
    %1 = vector.load %arg2[%c0_1, %c0_2] : memref<16x4xf32, #tpu.memory_space<vmem>>, vector<16x4xf32>
    %cst = arith.constant dense<0.000000e+00> : vector<16x256xf32>
    %2 = tpu.matmul %1, %0, %cst {dimension_numbers = #tpu.dot_dimension_numbers<[1], [0], [0], [1], [0, 0, 1, 1], [], []>} : vector<16x4xf32>, vector<4x256xf32>, vector<16x256xf32> -> vector<16x256xf32>
    %c0_3 = arith.constant 0 : index
    %c0_4 = arith.constant 0 : index
    %3 = vector.load %arg3[%c0_3, %c0_4] : memref<16x1xf32, #tpu.memory_space<vmem>>, vector<16x1xf32>
    %4 = vector.broadcast %3 : vector<16x1xf32> to vector<16x256xf32>
    %5 = arith.addf %2, %4 : vector<16x256xf32>
    %cst_5 = arith.constant 0.000000e+00 : f32
    %6 = vector.broadcast %cst_5 : f32 to vector<16x256xf32>
    %7 = arith.maximumf %5, %6 : vector<16x256xf32>
    %c0_6 = arith.constant 0 : index
    %c0_7 = arith.constant 0 : index
    %8 = vector.load %arg4[%c0_6, %c0_7] : memref<24x16xf32, #tpu.memory_space<vmem>>, vector<24x16xf32>
    %cst_8 = arith.constant dense<0.000000e+00> : vector<24x256xf32>
    %9 = tpu.matmul %8, %7, %cst_8 {dimension_numbers = #tpu.dot_dimension_numbers<[1], [0], [0], [1], [0, 0, 1, 1], [], []>} : vector<24x16xf32>, vector<16x256xf32>, vector<24x256xf32> -> vector<24x256xf32>
    %c0_9 = arith.constant 0 : index
    %c0_10 = arith.constant 0 : index
    %10 = vector.load %arg5[%c0_9, %c0_10] : memref<24x1xf32, #tpu.memory_space<vmem>>, vector<24x1xf32>
    %11 = vector.broadcast %10 : vector<24x1xf32> to vector<24x256xf32>
    %12 = arith.addf %9, %11 : vector<24x256xf32>
    %cst_11 = arith.constant 0.000000e+00 : f32
    %13 = vector.broadcast %cst_11 : f32 to vector<24x256xf32>
    %14 = arith.maximumf %12, %13 : vector<24x256xf32>
    %c0_12 = arith.constant 0 : index
    %c0_13 = arith.constant 0 : index
    %15 = vector.load %arg6[%c0_12, %c0_13] : memref<3x24xf32, #tpu.memory_space<vmem>>, vector<3x24xf32>
    %cst_14 = arith.constant dense<0.000000e+00> : vector<3x256xf32>
    %16 = tpu.matmul %15, %14, %cst_14 {dimension_numbers = #tpu.dot_dimension_numbers<[1], [0], [0], [1], [0, 0, 1, 1], [], []>} : vector<3x24xf32>, vector<24x256xf32>, vector<3x256xf32> -> vector<3x256xf32>
    %c0_15 = arith.constant 0 : index
    %c0_16 = arith.constant 0 : index
    %17 = vector.load %arg7[%c0_15, %c0_16] : memref<3x1xf32, #tpu.memory_space<vmem>>, vector<3x1xf32>
    %18 = vector.broadcast %17 : vector<3x1xf32> to vector<3x256xf32>
    %19 = arith.addf %16, %18 : vector<3x256xf32>
    %c0_17 = arith.constant 0 : index
    %c0_18 = arith.constant 0 : index
    %20 = vector.load %arg8[%c0_17, %c0_18] : memref<3x256xf32, #tpu.memory_space<vmem>>, vector<3x256xf32>
    tpu.vector_store %arg8[%c0_17, %c0_18], %19 {strides = array<i32>} : memref<3x256xf32, #tpu.memory_space<vmem>>, vector<3x256xf32>,
    return
  }
  func.func @transform_0(%arg0: i32) -> (i32, i32) {
    %c0_i32 = arith.constant 0 : i32
    %c0_i32_0 = arith.constant 0 : i32
    return %c0_i32, %arg0 : i32, i32
  }
  func.func @transform_1(%arg0: i32) -> (i32, i32) {
    %c0_i32 = arith.constant 0 : i32
    %c0_i32_0 = arith.constant 0 : i32
    %c0_i32_1 = arith.constant 0 : i32
    return %c0_i32, %c0_i32_0 : i32, i32
  }
  func.func @transform_2(%arg0: i32) -> (i32, i32) {
    %c0_i32 = arith.constant 0 : i32
    %c0_i32_0 = arith.constant 0 : i32
    %c0_i32_1 = arith.constant 0 : i32
    return %c0_i32, %c0_i32_0 : i32, i32
  }
  func.func @transform_3(%arg0: i32) -> (i32, i32) {
    %c0_i32 = arith.constant 0 : i32
    %c0_i32_0 = arith.constant 0 : i32
    %c0_i32_1 = arith.constant 0 : i32
    return %c0_i32, %c0_i32_0 : i32, i32
  }
  func.func @transform_4(%arg0: i32) -> (i32, i32) {
    %c0_i32 = arith.constant 0 : i32
    %c0_i32_0 = arith.constant 0 : i32
    %c0_i32_1 = arith.constant 0 : i32
    return %c0_i32, %c0_i32_0 : i32, i32
  }
  func.func @transform_5(%arg0: i32) -> (i32, i32) {
    %c0_i32 = arith.constant 0 : i32
    %c0_i32_0 = arith.constant 0 : i32
    %c0_i32_1 = arith.constant 0 : i32
    return %c0_i32, %c0_i32_0 : i32, i32
  }
  func.func @transform_6(%arg0: i32) -> (i32, i32) {
    %c0_i32 = arith.constant 0 : i32
    %c0_i32_0 = arith.constant 0 : i32
    %c0_i32_1 = arith.constant 0 : i32
    return %c0_i32, %c0_i32_0 : i32, i32
  }
  func.func @transform_7(%arg0: i32) -> (i32, i32) {
    %c0_i32 = arith.constant 0 : i32
    %c0_i32_0 = arith.constant 0 : i32
    return %c0_i32, %arg0 : i32, i32
  }
}

</mosaic_0001>

<bundles_post_ra>
// kernel: ann_forward_t.1
= control target key start
LH: loop header
LB: loop body
LE: loop exit
PB: predicated region body
PF: predicated region fallthrough
CT: control target
= control target key end

     0   :  { %12 = vsyncpa [#allocation3], 0  ;;  %s881_s0 = inlined_call_operand.vmem [shape: f32[4,512], index: 0, kind: input, shape index: {}]   ;;  %s882_s1 = inlined_call_operand.vmem [shape: f32[16,4], index: 1, kind: input, shape index: {}]   ;;  %s883_s2 = inlined_call_operand.vmem [shape: f32[16,1], index: 2, kind: input, shape index: {}]   ;;  %s884_s3 = inlined_call_operand.vmem [shape: f32[24,16], index: 3, kind: input, shape index: {}]   ;;  %s885_s4 = inlined_call_operand.vmem [shape: f32[24,1], index: 4, kind: input, shape index: {}]   ;;  %s886_s5 = inlined_call_operand.vmem [shape: f32[3,24], index: 5, kind: input, shape index: {}]   ;;  %s887_s6 = inlined_call_operand.vmem [shape: f32[3,1], index: 6, kind: input, shape index: {}]   ;;  %s888_s7 = inlined_call_operand.hbm [shape: f32[3,512], index: 7, kind: output, shape index: {}]  }
   0x1   :  { %14 = vsyncpa [#allocation3 + $0x1], 0  ;;  %s758_s24 = smov 0   ;;  %s760_s25 = smov 0  }
   0x2   :  { %s762_s26 = smov 0   ;;  %s764_s27 = smov 0  }
   0x3 LB: > { %s779_s28 = sadd.s32 4294967295, %s715_s27   ;;  %s583_s29 = sadd.s32 4294967294, %s715_s27   ;;  %s715_s27 = sphi %s764_s27, %s894_s27   ;;  %s711_s26 = sphi %s762_s26, %s893_s26   ;;  %s707_s25 = sphi %s760_s25, %s892_s25   ;;  %s703_s24 = sphi %s758_s24, %s891_s24  }
   0x4   : > { %s783_s30 = sadd.s32 1, %s715_s27   ;;  %s179_s8 = sadd.s32 1, %s711_s26 }
   0x5   : > { %s176_s9 = ssub.s32 %s715_s27, %s783_s30  ;;  %p189_p0 = scmp.ne.s32.totalorder %s711_s26, %s707_s25 }
   0x6   : > { %p177_p1 = scmp.eq.s32.totalorder %s176_s9, 0  ;;  %p190_p2 = scmp.eq.s32.totalorder %s779_s28, 1 }
   0x7   : > { %p195_p3 = scmp.ne.s32.totalorder %s707_s25, %s703_s24  ;;  %p196_p4 = scmp.eq.s32.totalorder %s583_s29, 1 }
   0x8   : > { %s794_s10 = scalar_select %p177_p1, %s711_s26, %s179_s8  }
   0x9   : > { %p796_p5 = por %p190_p2, %p189_p0  ;;  %p800_p6 = por %p196_p4, %p195_p3 }
   0xa   : > { %p586_p7 = scmp.ge.s32.totalorder %s715_s27, 1  ;;  %p241_p8 = scmp.lt.s32.totalorder %s715_s27, 3 }
   0xc   : > { %p242_p9 = pnand %p586_p7, %p241_p8 }
   0xd   : > { %s588_s13 = sshll.u32 (!%p242_p9), %s779_s28, 1  ;;  %s270_s14 = sand.u32 (!%p242_p9), 1, %s707_s25  }
   0xe   : > { %245 = sbr.rel (%p242_p9) target bundleno = 464 (0x1d0), region = 48  ;;  %p274_p10 = scmp.lt.s32.totalorder (!%p242_p9), %s588_s13, 3 }
   0xf   : > { %s587_s15 = sshll.u32 (!%p242_p9), %s270_s14, 3 }
  0x10   : > { %s272_s20 = scalar_lea.vmem (!%p242_p9), [#allocation2], %s587_s15 }
  0x11   : > { %s521_s21 = sshll.u32 (!%p242_p9), %s272_s20, 4  ;;  %s522_s21 = int_to_ptr.vmem [resolvable:$true] %s521_s21 }
  0x13   : > { %v284_v0 = vld [vmem:[%s883_s2 + $0x8] sm:$0xff]  ;;  %v717_v1 = vmov 0   ;;  %s896_s13 = smov (!%p274_p10, %s588_s13), 3  ;;  %v283_v3 = vld [vmem:[%s883_s2] sm:$0xff]  ;;  %vm306_vm0 = vcmask 1043456   ;;  %vm299_vm1 = vcmask 31744  }
  0x14   : > { %650 = vset.pattern.permute.xlu0 %v717_v1  ;;  %651 = vset.pattern.permute.xlu1 %v717_v1  ;;  %s589_s16 = sshll.u32 %s896_s13, 2  ;;  %v281_v4 = vld [vmem:[%s882_s1] sm:$0xff]  ;;  %v282_v7 = vld [vmem:[%s882_s1 + $0x8] sm:$0xff]  ;;  %v366_v11 = vld [vmem:[%s885_s4 + $0x10] sm:$0xff]  ;;  %vm382_vm2 = vcmask 130048   ;;  %vm457_vm3 = vcmask 195584  }
  0x15   : > { %292 = vperm.xlu0 %650, %v284_v0   ;;  %652 = vset.pattern.permute.xlu2 %v717_v1  ;;  %s277_s19 = scalar_lea.vmem %s881_s0, %s589_s16  ;;  %v364_v12 = vld [vmem:[%s885_s4] sm:$0xff]  ;;  %v365_v14 = vld [vmem:[%s885_s4 + $0x8] sm:$0xff]  ;;  %v363_v28 = vld [vmem:[%s884_s3 + $0x10] sm:$0xff]  ;;  %s609_s16 = sshll.u32 %s779_s28, 3 }
  0x16   : > { %v280_v2 = vld [vmem:[%s277_s19] sm:$0xff]  ;;  %379 = vperm.xlu1 %651, %v366_v11   ;;  %369 = vperm.xlu2 %652, %v364_v12   ;;  %v362_v27 = vld [vmem:[%s884_s3 + $0x8] sm:$0xff]  ;;  %s519_s19 = scalar_lea.hbm %s888_s7, %s609_s16  ;;  %s508_s28 = scalar_lea.sflag [#allocation3], %s270_s14 }
  0x17   : > { %296 = vst [vmem:[#allocation1] ss:$2 sm:$0xff] %v280_v2  ;;  %v451_v15 = vld [vmem:[%s887_s6] sm:$0x7]  ;;  %s523_s22 = sshll.u32 %s519_s19, 4  ;;  %s673_s13 = scalar_lea.hbm %s888_s7, 16  ;;  %s524_s22 = int_to_ptr.hbm [resolvable:$true] %s523_s22 }
  0x18   : > { %v361_v26 = vld [vmem:[%s884_s3] sm:$0xff]  ;;  %s667_s23 = sshra.s32 %s524_s22, 4  ;;  %s668_s23 = int_to_ptr.hbm [resolvable:$true] %s667_s23 }
  0x19   : > { %v450_v50 = vld [vmem:[%s886_s5] sm:$0x7]  ;;  %s669_s29 = scalar_lea.hbm %s668_s23, 8  ;;  %p674_p0 = scmp.lt.s32.totalorder %s668_s23, %s888_s7 }
  0x1a   : > { %p670_p11 = scmp.ne.s32.totalorder %s668_s23, %s669_s29  ;;  %p675_p1 = scmp.lt.s32.totalorder %s673_s13, %s669_s29 }
  0x1c   : > { %p671_p12 = pnand %p670_p11, %p796_p5  ;;  %p676_p2 = por %p675_p1, %p674_p0 }
  0x1d   : > { %287 = vperm.xlu0 %650, %v283_v3  }
  0x1e   : > { %v297_v5 = vld.sshfl [vmem:[#allocation1] sm:$0xff pattern:$0x75316420]  ;;  %v298_v6 = vld.sshfl [vmem:[#allocation1 + $0x8] sm:$0xff pattern:$0x75316420]  ;;  %374 = vperm.xlu1 %651, %v365_v14   ;;  %454 = vperm.xlu2 %652, %v451_v15   ;;  %p672_p13 = pneg %p671_p12 }
  0x1f   : > { %590 = vmatpush.msk.msra.mxu0 %vm306_vm0, %v297_v5  ;;  %593 = vmatpush.msk.msra.mxu1 %vm306_vm0, %v298_v6 }
  0x20   : > { %591 = vmatmul.msk.f32.vlgmr.msra.gmra.mxu0 %vm299_vm1, %v281_v4  ;;  %594 = vmatmul.msk.f32.vlgmr.msra.gmra.mxu1 %vm299_vm1, %v281_v4  ;;  %p677_p3 = pnand %p676_p2, %p672_p13 }
  0x28   : > { %592 = vmatmul.msk.f32.gmra.mxu0 %vm299_vm1, %v282_v7  ;;  %595 = vmatmul.msk.f32.gmra.mxu1 %vm299_vm1, %v282_v7 }
  0x70   : > { %v370_v35 = vpop.permute.xlu2 %369 }
  0x78   : > { %v455_v51 = vpop.permute.xlu2 %454 }
  0x87   : > { %v293_v8 = vpop.permute.xlu0 %292 }
  0x88   : > { %v380_v31 = vpop.permute.xlu1 %379 }
  0x8f   : > { %v288_v13 = vpop.permute.xlu0 %287 }
  0x90   : > { %v375_v34 = vpop.permute.xlu1 %374 }
  0x9d   : > { %v328_v9 = vpop.f32.mrf.mxu0  ;;  %v351_v10 = vpop.f32.mrf.mxu1 }
  0x9e   : > { %v329_v16 = vadd.f32 %v328_v9, %v288_v13  ;;  %v352_v19 = vadd.f32 %v351_v10, %v288_v13 }
  0xa0   : > { %v357_v24 = vmax.f32 %v329_v16, 0.0  ;;  %v358_v25 = vmax.f32 %v352_v19, 0.0 }
  0xa5   : > { %v331_v17 = vpop.f32.mrf.mxu0  ;;  %v354_v18 = vpop.f32.mrf.mxu1 }
  0xa6   : > { %v332_v20 = vadd.f32 %v331_v17, %v293_v8  ;;  %v355_v21 = vadd.f32 %v354_v18, %v293_v8 }
  0xa8   : > { %v359_v22 = vmax.f32 %v332_v20, 0.0  ;;  %v360_v23 = vmax.f32 %v355_v21, 0.0 }
  0xaa   : > { %406 = vmatpush.msra.mxu2 %v359_v22  ;;  %432 = vmatpush.msra.mxu3 %v360_v23 }
  0xac   : > { %407 = vmatpush.msra.mxu2 %v357_v24  ;;  %433 = vmatpush.msra.mxu3 %v358_v25 }
  0xad   : > { %596 = vmatmul.msk.f32.vlgmr.msra.gmra.mxu2 %vm382_vm2, %v361_v26  ;;  %599 = vmatmul.msk.f32.vlgmr.msra.gmra.mxu3 %vm382_vm2, %v361_v26 }
  0xb5   : > { %597 = vmatmul.msk.f32.gmra.mxu2 %vm382_vm2, %v362_v27  ;;  %600 = vmatmul.msk.f32.gmra.mxu3 %vm382_vm2, %v362_v27 }
  0xbd   : > { %598 = vmatmul.msk.f32.gmra.mxu2 %vm382_vm2, %v363_v28  ;;  %601 = vmatmul.msk.f32.gmra.mxu3 %vm382_vm2, %v363_v28 }
 0x130   : > { %v409_v29 = vpop.f32.mrf.mxu2  ;;  %v435_v30 = vpop.f32.mrf.mxu3 }
 0x131   : > { %v410_v42 = vadd.f32 %v409_v29, %v370_v35  ;;  %v436_v43 = vadd.f32 %v435_v30, %v370_v35 }
 0x133   : > { %v444_v48 = vmax.f32 %v410_v42, 0.0  ;;  %v445_v49 = vmax.f32 %v436_v43, 0.0 }
 0x138   : > { %v412_v32 = vpop.f32.mrf.mxu2  ;;  %v438_v33 = vpop.f32.mrf.mxu3 }
 0x139   : > { %v413_v38 = vadd.f32 %v412_v32, %v375_v34  ;;  %v439_v39 = vadd.f32 %v438_v33, %v375_v34 }
 0x13b   : > { %v446_v46 = vmax.f32 %v413_v38, 0.0  ;;  %v447_v47 = vmax.f32 %v439_v39, 0.0 }
 0x140   : > { %v415_v36 = vpop.f32.mrf.mxu2  ;;  %v441_v37 = vpop.f32.mrf.mxu3 }
 0x141   : > { %v416_v40 = vadd.f32 %v415_v36, %v380_v31  ;;  %v442_v41 = vadd.f32 %v441_v37, %v380_v31 }
 0x143   : > { %v448_v44 = vmax.f32 %v416_v40, 0.0  ;;  %v449_v45 = vmax.f32 %v442_v41, 0.0 }
 0x145   : > { %474 = vmatpush.msrb.mxu0 %v448_v44  ;;  %494 = vmatpush.msrb.mxu1 %v449_v45 }
 0x147   : > { %475 = vmatpush.msrb.mxu0 %v446_v46  ;;  %495 = vmatpush.msrb.mxu1 %v447_v47 }
 0x149   : > { %476 = vmatpush.msrb.mxu0 %v444_v48  ;;  %496 = vmatpush.msrb.mxu1 %v445_v49 }
 0x14a   : > { %602 = vmatmul.msk.f32.vlgmr.msrb.gmra.mxu0 %vm457_vm3, %v450_v50  ;;  %603 = vmatmul.msk.f32.vlgmr.msrb.gmra.mxu1 %vm457_vm3, %v450_v50 }
 0x1c7   : > { %v478_v52 = vpop.f32.mrf.mxu0  ;;  %v498_v53 = vpop.f32.mrf.mxu1 }
 0x1c8   : > { %v499_v54 = vadd.f32 %v498_v53, %v455_v51  ;;  %v479_v55 = vadd.f32 %v478_v52, %v455_v51 }
 0x1ca   : > { %v503_v56 = vrot.slane %v499_v54, 4 }
 0x1cc   : > { %v504_v57 = vsel %vm306_vm0, %v479_v55, %v503_v56 }
 0x1cd   : > { %506 = vst [vmem:[%s272_s20] sm:$0x77] %v504_v57 }
 0x1ce   : > { %680 = shalt.err (!%p677_p3)
}
 0x1cf   : > { %610 = dma.vmem_to_hbm [thread:$0]  (%p796_p5), %s522_s21, 128, %s524_s22, %s508_s28  }
 0x1d0 PF: > { %p616_p4 = scmp.ge.s32.totalorder %s715_s27, 2  ;;  %s535_s14 = sand.u32 1, %s703_s24  }
 0x1d1   : > { %s536_s17 = scalar_lea.sflag [#allocation3], %s535_s14 }
 0x1d2   : > { %p613_p7 = pnand %p616_p4, %p800_p6 }
 0x1d4   : > { %p614_p8 = pneg %p613_p7 }
 0x1d6   : > { %698 = dma.done.wait (%p614_p8), %s536_s17, 128  }
 0x1d7   : > { %700 = vsyncadd (%p614_p8), %s536_s17, 4294967168  ;;  %p17_p9 = scmp.ge.s32.totalorder %s783_s30, 4   ;;  %s891_s24 = smov %s707_s25 }
 0x1d8   : > { %s892_s25 = smov %s711_s26  ;;  %s893_s26 = smov %s794_s10 }
 0x1d9   : > { %s894_s27 = smov %s783_s30  ;;  %19 = sbr.rel (!%p17_p9) target bundleno = 3 (0x3), region = 83 }
 0x1de   :  { %542 = vsyncpa [#allocation3], 1 }
 0x1df   :  { %544 = vsyncpa [#allocation3 + $0x1], 1 }

</bundles_post_ra>
